<compile_context>
chip_gen: v7x
topology: tpu7x:2x2x1
jax: 0.10.0
libtpu: 0.0.40
codegen_flags: <defaults>
</compile_context>

<pallas_src>
import jax
import jax.numpy as jnp
from jax.experimental import pallas as pl
from jax.experimental.pallas import tpu as pltpu


# ---------------------------------------------------------------------------
# Kernels
# ---------------------------------------------------------------------------
def _copy_kernel(x_ref, o_ref):
    # Identity copy of one lane/sublane-dense tile through VMEM.
    o_ref[...] = x_ref[...]


def _dma_copy_kernel(x_hbm, o_hbm, sem):
    # Whole-array HBM -> HBM DMA; no VMEM staging, no per-step pipeline cost.
    copy = pltpu.make_async_copy(x_hbm, o_hbm, sem)
    copy.start()
    copy.wait()


# ---------------------------------------------------------------------------
# Tiling heuristics (dtype-aware, byte-based)
# ---------------------------------------------------------------------------
def _sublane_multiple(itemsize: int) -> int:
    # Native (sublane, lane) tile is (8,128) in 32-bit; narrower dtypes pack
    # 2/4 rows per sublane -> require 16 / 32 rows for unmasked full-vreg vst.
    return {1: 32, 2: 16, 4: 8}.get(itemsize, 8)


def _pick_lane_width(total: int, sublane_mult: int) -> int | None:
    # Widest lane width (multiple of 128) that divides `total` and leaves a
    # row count that is a multiple of the dtype-aware sublane multiple.
    for cand in (8192, 4096, 2048, 1024, 512, 256, 128):
        if total % cand == 0 and (total // cand) % sublane_mult == 0:
            return cand
    return None


def _pick_block_rows(rows: int, lane: int, itemsize: int, sublane_mult: int,
                     target_bytes: int = 2 * 1024 * 1024) -> int:
    # Largest row block that (a) divides `rows`, (b) is a multiple of the
    # sublane multiple, and (c) keeps one buffer <= ~2 MiB.  With Pallas
    # double-buffering input+output that is <= 8 MiB of pipeline buffers,
    # which fits every generation's default scoped-VMEM with headroom, while
    # already sitting at the measured copy-roofline plateau.
    bytes_per_row = lane * itemsize
    max_rows = max(sublane_mult,
                   (target_bytes // bytes_per_row) // sublane_mult * sublane_mult)
    if rows <= max_rows:
        return rows
    cand = max_rows
    while cand >= sublane_mult:
        if rows % cand == 0:
            return cand
        cand -= sublane_mult
    return sublane_mult  # divides `rows` by construction of the lane pick


# ---------------------------------------------------------------------------
# Wrapper (forward pass of Flatten(size))
# ---------------------------------------------------------------------------
def _whole_array_dma_copy(x2d: jax.Array) -> jax.Array:
    # Robust fallback: single contiguous DMA, independent of shape/VMEM size.
    return pl.pallas_call(
        _dma_copy_kernel,
        out_shape=jax.ShapeDtypeStruct(x2d.shape, x2d.dtype),
        in_specs=[pl.BlockSpec(memory_space=pl.ANY)],
        out_specs=pl.BlockSpec(memory_space=pl.ANY),
        scratch_shapes=[pltpu.SemaphoreType.DMA(())],
    )(x2d)


def flatten_pallas(x: jax.Array, size: int) -> jax.Array:
    """Equivalent of torch Flatten(size): x.view(B, size)."""
    B = x.shape[0]
    total = B * size
    assert total == x.size, f"Flatten size mismatch: {x.shape} vs (B={B}, size={size})"

    # Zero-cost row-major view (this is the actual Flatten semantics).
    x_flat = jnp.reshape(x, (B, size))

    itemsize = jnp.dtype(x.dtype).itemsize
    sublane_mult = _sublane_multiple(itemsize)
    lane = _pick_lane_width(total, sublane_mult)

    if lane is None:
        # Shapes too irregular for a dense slab -> single whole-array DMA.
        return _whole_array_dma_copy(x_flat)

    rows = total // lane
    block_rows = _pick_block_rows(rows, lane, itemsize, sublane_mult)
    grid = rows // block_rows

    # Zero-cost view into a lane/sublane-dense slab.
    slab = jnp.reshape(x_flat, (rows, lane))

    out_slab = pl.pallas_call(
        _copy_kernel,
        out_shape=jax.ShapeDtypeStruct((rows, lane), x.dtype),
        grid=(grid,),
        in_specs=[pl.BlockSpec((block_rows, lane), lambda i: (i, 0))],
        out_specs=pl.BlockSpec((block_rows, lane), lambda i: (i, 0)),
        compiler_params=pltpu.CompilerParams(
            # Row-grid axis is independent -> shard across TensorCores (v7x).
            dimension_semantics=("parallel",),
        ),
    )(slab)

    # Zero-cost view back to the Flatten output shape.
    return jnp.reshape(out_slab, (B, size))


# ---------------------------------------------------------------------------
# Self-test
# ---------------------------------------------------------------------------
if __name__ == "__main__":
    key = jax.random.PRNGKey(0)
    # Small NCHW input consistent with a DC-GAN discriminator feature map.
    B, C, H, W = 2, 4, 16, 16
    size = C * H * W  # Flatten(size=1024)

    x = jax.random.normal(key, (B, C, H, W), dtype=jnp.float32)

    y = flatten_pallas(x, size)
    y = jax.block_until_ready(y)

    # Reference: plain row-major reshape (what torch .view does on contiguous NCHW).
    y_ref = jnp.reshape(x, (B, size))

    assert y.shape == (B, size), y.shape
    assert y.dtype == x.dtype, y.dtype
    assert bool(jnp.allclose(y, y_ref)), "mismatch vs reference reshape"

    print("KERNEL_OK")
</pallas_src>

<mosaic_0001>
module attributes {stable_mosaic.version = 11 : i64} {
  func.func @_copy_kernel(%arg0: i32, %arg1: memref<8x256xf32, #tpu.memory_space<vmem>>, %arg2: memref<8x256xf32, #tpu.memory_space<vmem>>) attributes {dimension_semantics = [#tpu.dimension_semantics<parallel>], iteration_bounds = array<i64: 1>, scalar_prefetch = 0 : i64, scratch_operands = 0 : i64, tpu.core_type = #tpu.core_type<tc>, window_params = [{transform_indices = @transform_0, window_bounds = array<i64: 8, 256>}, {transform_indices = @transform_1, window_bounds = array<i64: 8, 256>}]} {
    %c0 = arith.constant 0 : index
    %c0_0 = arith.constant 0 : index
    %0 = vector.load %arg1[%c0, %c0_0] : memref<8x256xf32, #tpu.memory_space<vmem>>, vector<8x256xf32>
    %c0_1 = arith.constant 0 : index
    %c0_2 = arith.constant 0 : index
    %1 = vector.load %arg2[%c0_1, %c0_2] : memref<8x256xf32, #tpu.memory_space<vmem>>, vector<8x256xf32>
    tpu.vector_store %arg2[%c0_1, %c0_2], %0 {strides = array<i32>} : memref<8x256xf32, #tpu.memory_space<vmem>>, vector<8x256xf32>,
    return
  }
  func.func @transform_0(%arg0: i32) -> (i32, i32) {
    %c0_i32 = arith.constant 0 : i32
    %c0_i32_0 = arith.constant 0 : i32
    return %arg0, %c0_i32 : i32, i32
  }
  func.func @transform_1(%arg0: i32) -> (i32, i32) {
    %c0_i32 = arith.constant 0 : i32
    %c0_i32_0 = arith.constant 0 : i32
    return %arg0, %c0_i32 : i32, i32
  }
}

</mosaic_0001>

<bundles_post_ra>
// kernel: tpu_custom_call.1
= control target key start
LH: loop header
LB: loop body
LE: loop exit
PB: predicated region body
PF: predicated region fallthrough
CT: control target
= control target key end

     0   :  { %6 = vsyncpa [#allocation3], 0  ;;  %s126_s0 = inlined_call_operand.hbm [shape: f32[8,256], index: 0, kind: input, shape index: {}]   ;;  %s127_s1 = inlined_call_operand.hbm [shape: f32[8,256], index: 1, kind: output, shape index: {}]  }
   0x1   :  { %7 = vsyncpa [#allocation4], 0  ;;  %s90_s6 = smov [#allocation2]   ;;  %s42_s10 = scalar_lea.hbm %s126_s0, 256 }
   0x2   :  { %s14_s7 = sshll.u32 %s90_s6, 4  ;;  %p43_p0 = scmp.ne.s32.totalorder %s126_s0, %s42_s10  ;;  %s15_s7 = int_to_ptr.vmem [resolvable:$true] %s14_s7 }
   0x3   :  { %p46_p1 = scmp.lt.u32.totalorder %s42_s10, %s126_s0 }
   0x5   :  { %p48_p2 = pnand %p46_p1, %p43_p0 }
   0x7   :  { %51 = shalt.err (!%p48_p2)
}
   0x8   :  { %s52_s15 = scalar_lea.vmem %s15_s7, 256  ;;  %p57_p4 = scmp.lt.s32.totalorder %s15_s7, %s15_s7 }
   0x9   :  { %p53_p3 = scmp.ne.s32.totalorder %s15_s7, %s52_s15  ;;  %p58_p5 = scmp.lt.s32.totalorder %s52_s15, %s52_s15 }
   0xb   :  { %p59_p6 = por %p58_p5, %p57_p4 }
   0xd   :  { %p60_p7 = pnand %p59_p6, %p53_p3 }
   0xf   :  { %63 = shalt.err (!%p60_p7)
}
  0x10   :  { %17 = dma.hbm_to_vmem [thread:$0]  %s126_s0, 256, %s15_s7, [#allocation3]  }
  0x11   :  { %86 = dma.done.wait [#allocation3], 256  }
  0x12   :  { %87 = vsyncadd [#allocation3], 4294967040  ;;  %s91_s18 = smov [#allocation5]   ;;  %v21_v0 = vld [vmem:[#allocation2] sm:$0xff]  ;;  %v22_v1 = vld [vmem:[#allocation2 + $0x8] sm:$0xff] }
  0x13   :  { %s31_s19 = sshll.u32 %s91_s18, 4  ;;  %23 = vst [vmem:[#allocation5] sm:$0xff] %v21_v0  ;;  %24 = vst [vmem:[#allocation5 + $0x8] sm:$0xff] %v22_v1  ;;  %s32_s19 = int_to_ptr.vmem [resolvable:$true] %s31_s19 }
  0x14   :  { %s64_s20 = scalar_lea.vmem %s32_s19, 256  ;;  %p69_p9 = scmp.lt.s32.totalorder %s32_s19, %s32_s19 }
  0x15   :  { %p65_p8 = scmp.ne.s32.totalorder %s32_s19, %s64_s20  ;;  %p70_p10 = scmp.lt.s32.totalorder %s64_s20, %s64_s20 }
  0x17   :  { %p71_p11 = por %p70_p10, %p69_p9 }
  0x19   :  { %p72_p12 = pnand %p71_p11, %p65_p8 }
  0x1b   :  { %75 = shalt.err (!%p72_p12)
}
  0x1c   :  { %s76_s0 = scalar_lea.hbm %s127_s1, 256 }
  0x1d   :  { %p77_p13 = scmp.ne.s32.totalorder %s127_s1, %s76_s0  ;;  %p80_p0 = scmp.lt.u32.totalorder %s76_s0, %s127_s1 }
  0x1f   :  { %p82_p1 = pnand %p80_p0, %p77_p13 }
  0x21   :  { %85 = shalt.err (!%p82_p1)
}
  0x22   :  { %34 = dma.vmem_to_hbm [thread:$0]  %s32_s19, 256, %s127_s1, [#allocation4]  }
  0x23   :  { %88 = dma.done.wait [#allocation4], 256  }
  0x24   :  { %89 = vsyncadd [#allocation4], 4294967040 }
  0x25   :  { %38 = vsyncpa [#allocation3], 1 }
  0x26   :  { %39 = vsyncpa [#allocation4], 1 }

</bundles_post_ra>
